<compile_context>
chip_gen: v7x
topology: tpu7x:2x2x1
jax: 0.10.0
libtpu: 0.0.40
codegen_flags: <defaults>
</compile_context>

<pallas_src>
import functools
import math

import jax
import jax.numpy as jnp
from jax import lax
from jax.experimental import pallas as pl
from jax.experimental.pallas import tpu as pltpu


_VMEM_LIMIT = 32 * 1024 * 1024  # safe on v5e/v6e (128 MiB) and v7x (64 MiB)


# ----------------------------------------------------------------------------
# Kernel 1: fused sentence path
#   mean over tokens -> classifier (Dout=1 as VPU reduction) -> masked BCE
#   (logits form), accumulated across row tiles into a (1,1) output block.
# ----------------------------------------------------------------------------
def _sentence_ext_loss_kernel(ctx_ref, w_cls_ref, b_cls_ref, lbl_ref, o_ref):
    r = pl.program_id(0)

    @pl.when(r == 0)
    def _init():
        o_ref[...] = jnp.zeros_like(o_ref)

    ctx = ctx_ref[...]                                    # (tr, S2, H) f32
    sent_vec = jnp.mean(ctx, axis=1)                      # (tr, H)

    # Dout=1 classifier as a lane reduction (avoids MXU + lane-width-1 stores).
    logit = jnp.sum(sent_vec * w_cls_ref[...], axis=-1, keepdims=True)
    logit = logit + b_cls_ref[...]                        # (tr, 1)

    y = lbl_ref[...]                                      # (tr, 1) f32, -1 = pad
    mask = (y != -1.0).astype(jnp.float32)
    # BCE(sigmoid(x), y) = softplus(x) - y*x  (stable; no log(0) saturation).
    softplus = jnp.maximum(logit, 0.0) + jnp.log1p(jnp.exp(-jnp.abs(logit)))
    bce = softplus - y * logit
    o_ref[...] += jnp.sum(bce * mask)


def sentence_ext_loss(contexts4, w_cls, b_cls, ext_label, *, tile_rows=512):
    b, s1, s2, h = contexts4.shape
    n = b * s1
    ctx = contexts4.reshape(n, s2, h)
    lbl = ext_label.astype(jnp.float32).reshape(n, 1)

    tr = n if n <= tile_rows else tile_rows
    assert n % tr == 0, "row tile must divide number of sentences"
    grid = (n // tr,)

    cost = pl.CostEstimate(
        flops=int(n * s2 * h + 4 * n * h),
        transcendentals=int(2 * n),
        bytes_accessed=int(4 * (n * s2 * h + n + h + 2)))

    out = pl.pallas_call(
        _sentence_ext_loss_kernel,
        out_shape=jax.ShapeDtypeStruct((1, 1), jnp.float32),
        grid=grid,
        in_specs=[
            pl.BlockSpec((tr, s2, h), lambda r: (r, 0, 0)),
            pl.BlockSpec((1, h), lambda r: (0, 0)),
            pl.BlockSpec((1, 1), lambda r: (0, 0)),
            pl.BlockSpec((tr, 1), lambda r: (r, 0)),
        ],
        out_specs=pl.BlockSpec((1, 1), lambda r: (0, 0)),
        compiler_params=pltpu.CompilerParams(
            dimension_semantics=("arbitrary",),
            vmem_limit_bytes=_VMEM_LIMIT),
        cost_estimate=cost,
    )(ctx, w_cls, b_cls, lbl)
    return out[0, 0]


# ----------------------------------------------------------------------------
# Kernel 2: fused decoder path
#   (dec_emb + q_mean) -> Linear+tanh -> compute_score -> log_softmax
#   -> label-smoothing KL (reduction='sum', accumulated per batch).
#   grid = (batch "parallel", dec-row-tiles "arbitrary")
# ----------------------------------------------------------------------------
def _decoder_fused_kernel(dec_ref, q_ref, wdec_ref, bdec_ref, wsc_ref, bsc_ref,
                          tgt_ref, scores_ref, kl_ref, *,
                          confidence, smoothing_value,
                          log_confidence, log_smoothing, padding_idx):
    t_idx = pl.program_id(1)

    @pl.when(t_idx == 0)
    def _init():
        kl_ref[...] = jnp.zeros_like(kl_ref)

    # --- decoder stand-in: conditioning add fused with Linear + tanh --------
    x = (dec_ref[0] + q_ref[0]).astype(jnp.bfloat16)          # (tq, H)
    h = jnp.dot(x, wdec_ref[...], preferred_element_type=jnp.float32)
    h = jnp.tanh(h + bdec_ref[...])                           # (tq, H) f32

    # --- compute_score + log_softmax (fused, exp/log on EUP) ----------------
    logits = jnp.dot(h.astype(jnp.bfloat16), wsc_ref[...],
                     preferred_element_type=jnp.float32)
    logits = logits + bsc_ref[...]                            # (tq, V) f32
    m = jnp.max(logits, axis=-1, keepdims=True)
    z = logits - m
    lse = jnp.log(jnp.sum(jnp.exp(z), axis=-1, keepdims=True))
    log_probs = z - lse
    scores_ref[0] = log_probs

    # --- LabelSmoothingLoss: model_prob built in-regs, KL sum accumulated ---
    t = tgt_ref[0]                                            # (tq, 1) int32
    tq, v = log_probs.shape
    col = lax.broadcasted_iota(jnp.int32, (tq, v), 1)
    is_tgt = col == t
    p = jnp.where(is_tgt, confidence,
                  jnp.where(col == padding_idx, 0.0, smoothing_value))
    p = jnp.where(t == padding_idx, 0.0, p)                   # mask pad rows
    logp = jnp.where(is_tgt, log_confidence, log_smoothing)   # constants only
    kl = jnp.where(p > 0.0, p * (logp - log_probs), 0.0)
    kl_ref[...] += jnp.sum(kl)


def decoder_score_loss(dec_emb, q_mean, w_dec, b_dec, w_score, b_score,
                       targets, *, confidence, smoothing_value, padding_idx,
                       tile_t=256):
    bsz, tdec, h = dec_emb.shape
    v = w_score.shape[1]
    tq = tdec if tdec <= tile_t else tile_t
    assert tdec % tq == 0, "decoder row tile must divide decode length"
    grid = (bsz, tdec // tq)

    tgt = targets.astype(jnp.int32).reshape(bsz, tdec, 1)

    kern = functools.partial(
        _decoder_fused_kernel,
        confidence=float(confidence),
        smoothing_value=float(smoothing_value),
        log_confidence=float(math.log(confidence)),
        log_smoothing=float(math.log(smoothing_value)),
        padding_idx=int(padding_idx))

    n = bsz * tdec
    cost = pl.CostEstimate(
        flops=int(2 * n * h * h + 2 * n * h * v + 8 * n * v),
        transcendentals=int(n * h + n * v + n),
        bytes_accessed=int(4 * (n * h + bsz * h + n * v + n + bsz)
                           + 2 * (h * h + h * v) + 4 * (h + v)))

    scores, kl_part = pl.pallas_call(
        kern,
        out_shape=(jax.ShapeDtypeStruct((bsz, tdec, v), jnp.float32),
                   jax.ShapeDtypeStruct((bsz, 1, 1), jnp.float32)),
        grid=grid,
        in_specs=[
            pl.BlockSpec((1, tq, h), lambda b, t: (b, t, 0)),   # dec_emb
            pl.BlockSpec((1, 1, h), lambda b, t: (b, 0, 0)),    # q_mean
            pl.BlockSpec((h, h), lambda b, t: (0, 0)),          # w_dec (bf16)
            pl.BlockSpec((1, h), lambda b, t: (0, 0)),          # b_dec
            pl.BlockSpec((h, v), lambda b, t: (0, 0)),          # w_score (bf16)
            pl.BlockSpec((1, v), lambda b, t: (0, 0)),          # b_score
            pl.BlockSpec((1, tq, 1), lambda b, t: (b, t, 0)),   # targets
        ],
        out_specs=(
            pl.BlockSpec((1, tq, v), lambda b, t: (b, t, 0)),   # log-probs
            pl.BlockSpec((1, 1, 1), lambda b, t: (b, 0, 0)),    # per-batch KL
        ),
        compiler_params=pltpu.CompilerParams(
            dimension_semantics=("parallel", "arbitrary"),
            vmem_limit_bytes=_VMEM_LIMIT),
        cost_estimate=cost,
    )(dec_emb, q_mean, w_dec, b_dec, w_score, b_score, tgt)
    return scores, jnp.sum(kl_part)


# ----------------------------------------------------------------------------
# Model
# ----------------------------------------------------------------------------
class Tensor2TensorPallas:
    def __init__(self, key, hidden_size=32, vocab_size=128,
                 label_smoothing=0.1, tgt_padding_idx=0):
        self.hidden_size = hidden_size
        self.vocab_size = vocab_size
        self.padding_idx = tgt_padding_idx
        self.smoothing_value = label_smoothing / (vocab_size - 2)
        self.confidence = 1.0 - label_smoothing

        k = jax.random.split(key, 6)
        # shared src/tgt embedding (encoder.embedding in the original module)
        self.embedding = 0.1 * jax.random.normal(
            k[0], (vocab_size, hidden_size), jnp.float32)
        # models.Classifier stand-in: Linear(hidden, 1) + sigmoid (BCE fused)
        self.w_cls = 0.1 * jax.random.normal(k[1], (1, hidden_size), jnp.float32)
        self.b_cls = jnp.zeros((1, 1), jnp.float32)
        # TransformerDecoder stand-in projection (bf16 MXU operands)
        self.w_dec = (0.1 * jax.random.normal(
            k[2], (hidden_size, hidden_size), jnp.float32)).astype(jnp.bfloat16)
        self.b_dec = jnp.zeros((1, hidden_size), jnp.float32)
        # compute_score = nn.Linear(hidden_size, vocab_size) (bf16 operands)
        self.w_score = (0.1 * jax.random.normal(
            k[3], (hidden_size, vocab_size), jnp.float32)).astype(jnp.bfloat16)
        self.b_score = jnp.zeros((1, vocab_size), jnp.float32)

    def forward(self, src, dec, targets, src_extend_ids, tgt_extend_ids,
                max_ext_len, ext_label, adjs):
        return_dict = {}
        ds0, ds1, ds2 = src.shape
        src_flat = src.reshape(ds0, -1)
        _ = src_extend_ids.reshape(ds0, -1)      # only used on pointer path
        _ = (tgt_extend_ids, max_ext_len, adjs)  # pointer / gnn paths unused

        # TODO(synk): models.TransformerEncoder has no in-repo definition;
        # stand-in = deterministic embedding lookup producing `contexts`.
        contexts = self.embedding[src_flat]                    # (B, S1*S2, H)
        contexts4 = contexts.reshape(ds0, ds1, ds2, -1)

        # Fused Pallas kernel: mean-pool -> Classifier stand-in -> masked BCE.
        # TODO(synk): models.Classifier is external; stand-in = Linear+sigmoid.
        ext_loss = sentence_ext_loss(contexts4, self.w_cls, self.b_cls,
                                     ext_label)

        question_contexts = contexts4[:, 0]                    # (B, S2, H)
        q_mean = jnp.mean(question_contexts, axis=1, keepdims=True)  # (B,1,H)

        # TODO(synk): models.TransformerDecoder is external; stand-in =
        # embedding + question-context conditioning -> Linear+tanh, fused in
        # one Pallas kernel with compute_score + log_softmax +
        # LabelSmoothingLoss (kl_div, reduction='sum'). Pointer branch unused.
        dec_emb = self.embedding[dec]                          # (B, T, H)
        scores, mle = decoder_score_loss(
            dec_emb, q_mean, self.w_dec, self.b_dec,
            self.w_score, self.b_score, targets,
            confidence=self.confidence,
            smoothing_value=self.smoothing_value,
            padding_idx=self.padding_idx)

        return_dict["mle_loss"] = mle + 0.5 * ext_loss
        return return_dict, scores


# ----------------------------------------------------------------------------
# Demo
# ----------------------------------------------------------------------------
if __name__ == "__main__":
    key = jax.random.PRNGKey(0)
    k_src, k_dec, k_tgt, k_model = jax.random.split(key, 4)

    B, S1, S2, T, H, V = 2, 4, 8, 8, 32, 128   # (batch, sents, sent_len, dec_len)

    src = jax.random.randint(k_src, (B, S1, S2), 1, V, dtype=jnp.int32)
    dec = jax.random.randint(k_dec, (B, T), 1, V, dtype=jnp.int32)
    targets = jax.random.randint(k_tgt, (B, T), 1, V, dtype=jnp.int32)
    targets = targets.at[:, -2:].set(0)        # padded target positions
    src_extend_ids = src
    tgt_extend_ids = targets
    ext_label = jnp.array([[1, 0, 1, -1],
                           [0, 1, -1, -1]], dtype=jnp.int32)
    max_ext_len = 0
    adjs = None

    model = Tensor2TensorPallas(k_model, hidden_size=H, vocab_size=V,
                                label_smoothing=0.1, tgt_padding_idx=0)

    ret, scores = model.forward(src, dec, targets, src_extend_ids,
                                tgt_extend_ids, max_ext_len, ext_label, adjs)
    jax.block_until_ready((ret["mle_loss"], scores))

    assert scores.shape == (B, T, V)
    assert jnp.isfinite(ret["mle_loss"]).item()
    print("KERNEL_OK")
</pallas_src>

<mosaic_0001>
module attributes {stable_mosaic.version = 11 : i64} {
  func.func @_sentence_ext_loss_kernel(%arg0: i32, %arg1: memref<8x8x32xf32, #tpu.memory_space<vmem>>, %arg2: memref<1x32xf32, #tpu.memory_space<vmem>>, %arg3: memref<1x1xf32, #tpu.memory_space<vmem>>, %arg4: memref<8x1xf32, #tpu.memory_space<vmem>>, %arg5: memref<1x1xf32, #tpu.memory_space<vmem>>) attributes {dimension_semantics = [#tpu.dimension_semantics<arbitrary>], iteration_bounds = array<i64: 1>, scalar_prefetch = 0 : i64, scratch_operands = 0 : i64, tpu.core_type = #tpu.core_type<tc>, window_params = [{transform_indices = @transform_0, window_bounds = array<i64: 8, 8, 32>}, {pipeline_mode = #tpu.pipeline_mode<synchronous>, transform_indices = @transform_1, window_bounds = array<i64: 1, 32>}, {pipeline_mode = #tpu.pipeline_mode<synchronous>, transform_indices = @transform_2, window_bounds = array<i64: 1, 1>}, {transform_indices = @transform_3, window_bounds = array<i64: 8, 1>}, {pipeline_mode = #tpu.pipeline_mode<synchronous>, transform_indices = @transform_4, window_bounds = array<i64: 1, 1>}]} {
    %c0_i32 = arith.constant 0 : i32
    %0 = arith.cmpi eq, %arg0, %c0_i32 : i32
    %1 = arith.extui %0 : i1 to i32
    %c0_i32_0 = arith.constant 0 : i32
    %2 = arith.cmpi ne, %1, %c0_i32_0 : i32
    scf.if %2 {
      %cst_19 = arith.constant 0.000000e+00 : f32
      %39 = vector.broadcast %cst_19 : f32 to vector<1x1xf32>
      %c0_20 = arith.constant 0 : index
      %c0_21 = arith.constant 0 : index
      %40 = vector.load %arg5[%c0_20, %c0_21] : memref<1x1xf32, #tpu.memory_space<vmem>>, vector<1x1xf32>
      tpu.vector_store %arg5[%c0_20, %c0_21], %39 {strides = array<i32>} : memref<1x1xf32, #tpu.memory_space<vmem>>, vector<1x1xf32>,
    } else {
    }
    %c0 = arith.constant 0 : index
    %c0_1 = arith.constant 0 : index
    %c0_2 = arith.constant 0 : index
    %3 = vector.load %arg1[%c0, %c0_1, %c0_2] : memref<8x8x32xf32, #tpu.memory_space<vmem>>, vector<8x8x32xf32>
    %cst = arith.constant dense<0.000000e+00> : vector<8x32xf32>
    %4 = vector.multi_reduction <add>, %3, %cst [1] : vector<8x8x32xf32> to vector<8x32xf32>
    %cst_3 = arith.constant 8.000000e+00 : f32
    %5 = vector.broadcast %cst_3 : f32 to vector<8x32xf32>
    %6 = arith.divf %4, %5 : vector<8x32xf32>
    %c0_4 = arith.constant 0 : index
    %c0_5 = arith.constant 0 : index
    %7 = vector.load %arg2[%c0_4, %c0_5] : memref<1x32xf32, #tpu.memory_space<vmem>>, vector<1x32xf32>
    %8 = vector.broadcast %7 : vector<1x32xf32> to vector<8x32xf32>
    %9 = arith.mulf %6, %8 : vector<8x32xf32>
    %cst_6 = arith.constant dense<0.000000e+00> : vector<8xf32>
    %10 = vector.multi_reduction <add>, %9, %cst_6 [1] : vector<8x32xf32> to vector<8xf32>
    %11 = vector.shape_cast %10 : vector<8xf32> to vector<8x1xf32>
    %c0_7 = arith.constant 0 : index
    %c0_8 = arith.constant 0 : index
    %12 = vector.load %arg3[%c0_7, %c0_8] : memref<1x1xf32, #tpu.memory_space<vmem>>, vector<1x1xf32>
    %13 = vector.broadcast %12 : vector<1x1xf32> to vector<8x1xf32>
    %14 = arith.addf %11, %13 : vector<8x1xf32>
    %c0_9 = arith.constant 0 : index
    %c0_10 = arith.constant 0 : index
    %15 = vector.load %arg4[%c0_9, %c0_10] : memref<8x1xf32, #tpu.memory_space<vmem>>, vector<8x1xf32>
    %cst_11 = arith.constant -1.000000e+00 : f32
    %16 = vector.broadcast %cst_11 : f32 to vector<8x1xf32>
    %17 = arith.cmpf one, %15, %16 : vector<8x1xf32>
    %18 = arith.extui %17 : vector<8x1xi1> to vector<8x1xi32>
    %19 = arith.sitofp %18 : vector<8x1xi32> to vector<8x1xf32>
    %cst_12 = arith.constant 0.000000e+00 : f32
    %20 = vector.broadcast %cst_12 : f32 to vector<8x1xf32>
    %21 = arith.maximumf %14, %20 : vector<8x1xf32>
    %22 = math.absf %14 : vector<8x1xf32>
    %cst_13 = arith.constant 0.000000e+00 : f32
    %23 = vector.broadcast %cst_13 : f32 to vector<8x1xf32>
    %24 = arith.subf %23, %22 : vector<8x1xf32>
    %25 = math.exp %24 : vector<8x1xf32>
    %26 = math.log1p %25 : vector<8x1xf32>
    %27 = arith.addf %21, %26 : vector<8x1xf32>
    %28 = arith.mulf %15, %14 : vector<8x1xf32>
    %29 = arith.subf %27, %28 : vector<8x1xf32>
    %c0_14 = arith.constant 0 : index
    %c0_15 = arith.constant 0 : index
    %30 = vector.load %arg5[%c0_14, %c0_15] : memref<1x1xf32, #tpu.memory_space<vmem>>, vector<1x1xf32>
    %31 = arith.mulf %29, %19 : vector<8x1xf32>
    %32 = vector.shape_cast %31 : vector<8x1xf32> to vector<1x8x1xf32>
    %cst_16 = arith.constant dense<0.000000e+00> : vector<1xf32>
    %33 = vector.multi_reduction <add>, %32, %cst_16 [1, 2] : vector<1x8x1xf32> to vector<1xf32>
    %34 = vector.shape_cast %33 : vector<1xf32> to vector<1x1x1xf32>
    %35 = vector.extract %34[0, 0, 0] : f32 from vector<1x1x1xf32>
    %36 = vector.broadcast %35 : f32 to vector<1x1xf32>
    %37 = arith.addf %30, %36 : vector<1x1xf32>
    %c0_17 = arith.constant 0 : index
    %c0_18 = arith.constant 0 : index
    %38 = vector.load %arg5[%c0_17, %c0_18] : memref<1x1xf32, #tpu.memory_space<vmem>>, vector<1x1xf32>
    tpu.vector_store %arg5[%c0_17, %c0_18], %37 {strides = array<i32>} : memref<1x1xf32, #tpu.memory_space<vmem>>, vector<1x1xf32>,
    return
  }
  func.func @transform_0(%arg0: i32) -> (i32, i32, i32) {
    %c0_i32 = arith.constant 0 : i32
    %c0_i32_0 = arith.constant 0 : i32
    %c0_i32_1 = arith.constant 0 : i32
    return %arg0, %c0_i32, %c0_i32_0 : i32, i32, i32
  }
  func.func @transform_1(%arg0: i32) -> (i32, i32) {
    %c0_i32 = arith.constant 0 : i32
    %c0_i32_0 = arith.constant 0 : i32
    %c0_i32_1 = arith.constant 0 : i32
    return %c0_i32, %c0_i32_0 : i32, i32
  }
  func.func @transform_2(%arg0: i32) -> (i32, i32) {
    %c0_i32 = arith.constant 0 : i32
    %c0_i32_0 = arith.constant 0 : i32
    %c0_i32_1 = arith.constant 0 : i32
    return %c0_i32, %c0_i32_0 : i32, i32
  }
  func.func @transform_3(%arg0: i32) -> (i32, i32) {
    %c0_i32 = arith.constant 0 : i32
    %c0_i32_0 = arith.constant 0 : i32
    return %arg0, %c0_i32 : i32, i32
  }
  func.func @transform_4(%arg0: i32) -> (i32, i32) {
    %c0_i32 = arith.constant 0 : i32
    %c0_i32_0 = arith.constant 0 : i32
    %c0_i32_1 = arith.constant 0 : i32
    return %c0_i32, %c0_i32_0 : i32, i32
  }
}

</mosaic_0001>

<bundles_post_ra>
// kernel: tpu_custom_call.1
= control target key start
LH: loop header
LB: loop body
LE: loop exit
PB: predicated region body
PF: predicated region fallthrough
CT: control target
= control target key end

     0   :  { %s361_s0 = inlined_call_operand.hbm [shape: f32[8,8,32], index: 0, kind: input, shape index: {}]   ;;  %s362_s1 = inlined_call_operand.vmem [shape: f32[1,32], index: 1, kind: input, shape index: {}]   ;;  %s363_s2 = inlined_call_operand.<no memory space> [shape: f32[1,1], index: 2, kind: input, shape index: {}]   ;;  %s364_s3 = inlined_call_operand.vmem [shape: f32[8,1], index: 3, kind: input, shape index: {}]   ;;  %s365_s4 = inlined_call_operand.hbm [shape: f32[1,1], index: 4, kind: output, shape index: {}]  }
   0x1   :  { %v9_v0 = vstv %s363_s2 }
   0x2   :  { %10 = vst [vmem:[#allocation2] sm:$0x1] %v9_v0 }
   0x3   :  { %11 = vsyncpa [#allocation4], 0 }
   0x4   :  { %12 = vsyncpa [#allocation5], 0  ;;  %s285_s17 = smov [#allocation3]   ;;  %s237_s21 = scalar_lea.hbm %s361_s0, 1024 }
   0x5   :  { %s18_s18 = sshll.u32 %s285_s17, 4  ;;  %p238_p0 = scmp.ne.s32.totalorder %s361_s0, %s237_s21  ;;  %s19_s18 = int_to_ptr.vmem [resolvable:$true] %s18_s18 }
   0x6   :  { %p241_p1 = scmp.lt.u32.totalorder %s237_s21, %s361_s0 }
   0x8   :  { %p243_p2 = pnand %p241_p1, %p238_p0 }
   0xa   :  { %246 = shalt.err (!%p243_p2)
}
   0xb   :  { %s247_s2 = scalar_lea.vmem %s19_s18, 1024  ;;  %p252_p4 = scmp.lt.s32.totalorder %s19_s18, %s19_s18 }
   0xc   :  { %p248_p3 = scmp.ne.s32.totalorder %s19_s18, %s247_s2  ;;  %p253_p5 = scmp.lt.s32.totalorder %s247_s2, %s247_s2 }
   0xe   :  { %p254_p6 = por %p253_p5, %p252_p4 }
  0x10   :  { %p255_p7 = pnand %p254_p6, %p248_p3 }
  0x12   :  { %258 = shalt.err (!%p255_p7)
}
  0x13   :  { %s286_s26 = smov 128   ;;  %s287_s27 = smov 8  }
  0x14   :  { %24 = dma.hbm_to_vmem [thread:$0]  %s361_s0, 1024, %s19_s18, [#allocation4], %s286_s26, %s286_s26, %s287_s27  }
  0x15   :  { %281 = dma.done.wait [#allocation4], 1024  }
  0x16   :  { %282 = vsyncadd [#allocation4], 4294966272  ;;  %vm48_vm0 = vcmask 261120   ;;  %v40_v1 = vld [vmem:[#allocation3] sm:$0xff]  ;;  %v41_v2 = vld [vmem:[#allocation3 + $0x8] sm:$0xff]  ;;  %vm138_vm1 = vcmask 1041409  }
  0x17   :  { %v42_v3 = vld [vmem:[#allocation3 + $0x10] sm:$0xff]  ;;  %v43_v4 = vld [vmem:[#allocation3 + $0x18] sm:$0xff]  ;;  %v44_v5 = vld [vmem:[#allocation3 + $0x20] sm:$0xff]  ;;  %v49_v7 = vsel %vm48_vm0, %v40_v1, 0.0  ;;  %v56_v8 = vsel %vm48_vm0, %v41_v2, 0.0  ;;  %vm141_vm2 = vcmask 1042434  }
  0x18   :  { %v45_v6 = vld [vmem:[#allocation3 + $0x28] sm:$0xff]  ;;  %v63_v9 = vsel %vm48_vm0, %v42_v3, 0.0  ;;  %v46_v10 = vld [vmem:[#allocation3 + $0x30] sm:$0xff]  ;;  %v47_v11 = vld [vmem:[#allocation3 + $0x38] sm:$0xff]  ;;  %v50_v12 = vrot.slane %v49_v7, 4  ;;  %v57_v13 = vrot.slane %v56_v8, 4 }
  0x19   :  { %v64_v14 = vrot.slane %v63_v9, 4  ;;  %v70_v15 = vsel %vm48_vm0, %v43_v4, 0.0  ;;  %v77_v17 = vsel %vm48_vm0, %v44_v5, 0.0  ;;  %v84_v18 = vsel %vm48_vm0, %v45_v6, 0.0  ;;  %v223_v60 = vld [vmem:[%s362_s1] ss:$0 sm:$0xff] }
  0x1a   :  { %v71_v16 = vrot.slane %v70_v15, 4  ;;  %v91_v19 = vsel %vm48_vm0, %v46_v10, 0.0  ;;  %v51_v20 = vadd.f32 %v50_v12, %v49_v7  ;;  %v58_v21 = vadd.f32 %v57_v13, %v56_v8 }
  0x1b   :  { %v65_v22 = vadd.f32 %v64_v14, %v63_v9  ;;  %v78_v23 = vrot.slane %v77_v17, 4  ;;  %v85_v25 = vrot.slane %v84_v18, 4  ;;  %v92_v26 = vrot.slane %v91_v19, 4 }
  0x1c   :  { %v72_v24 = vadd.f32 %v71_v16, %v70_v15  ;;  %v98_v27 = vsel %vm48_vm0, %v47_v11, 0.0  ;;  %v52_v28 = vrot.slane %v51_v20, 2  ;;  %v59_v29 = vrot.slane %v58_v21, 2 }
  0x1d   :  { %v66_v30 = vrot.slane %v65_v22, 2  ;;  %v79_v31 = vadd.f32 %v78_v23, %v77_v17  ;;  %v86_v33 = vadd.f32 %v85_v25, %v84_v18  ;;  %v93_v34 = vadd.f32 %v92_v26, %v91_v19 }
  0x1e   :  { %v73_v32 = vrot.slane %v72_v24, 2  ;;  %v99_v35 = vrot.slane %v98_v27, 4  ;;  %v53_v36 = vadd.f32 %v52_v28, %v51_v20  ;;  %v60_v37 = vadd.f32 %v59_v29, %v58_v21 }
  0x1f   :  { %v67_v38 = vadd.f32 %v66_v30, %v65_v22  ;;  %v80_v39 = vrot.slane %v79_v31, 2  ;;  %v87_v41 = vrot.slane %v86_v33, 2  ;;  %v94_v42 = vrot.slane %v93_v34, 2 }
  0x20   :  { %v74_v40 = vadd.f32 %v73_v32, %v72_v24  ;;  %v100_v43 = vadd.f32 %v99_v35, %v98_v27  ;;  %v54_v44 = vrot.slane %v53_v36, 1  ;;  %v61_v45 = vrot.slane %v60_v37, 1 }
  0x21   :  { %v68_v46 = vrot.slane %v67_v38, 1  ;;  %v81_v47 = vadd.f32 %v80_v39, %v79_v31  ;;  %v88_v49 = vadd.f32 %v87_v41, %v86_v33  ;;  %v95_v50 = vadd.f32 %v94_v42, %v93_v34  ;;  %v224_v34 = vld [vmem:[#allocation2] ss:$0 sm:$0xff] }
  0x22   :  { %v75_v48 = vrot.slane %v74_v40, 1  ;;  %v101_v51 = vrot.slane %v100_v43, 2  ;;  %v55_v52 = vadd.f32 %v54_v44, %v53_v36  ;;  %v62_v53 = vadd.f32 %v61_v45, %v60_v37 }
  0x23   :  { %v69_v54 = vadd.f32 %v68_v46, %v67_v38  ;;  %v82_v55 = vrot.slane %v81_v47, 1  ;;  %v89_v57 = vrot.slane %v88_v49, 1  ;;  %v96_v58 = vrot.slane %v95_v50, 1  ;;  %v170_v46 = vld [vmem:[%s364_s3] sm:$0xff]  ;;  %s289_s3 = smov [#allocation6]  }
  0x24   :  { %v76_v56 = vadd.f32 %v75_v48, %v74_v40  ;;  %v102_v59 = vadd.f32 %v101_v51, %v100_v43  ;;  %v106_v62 = vmul.f32 0.125, %v55_v52  ;;  %v107_v63 = vmul.f32 0.125, %v62_v53  ;;  %s214_s6 = sshll.u32 %s289_s3, 4  ;;  %s215_s6 = int_to_ptr.vmem [resolvable:$true] %s214_s6 }
  0x25   :  { %v83_v61 = vadd.f32 %v82_v55, %v81_v47  ;;  %v108_v0 = vmul.f32 0.125, %v69_v54  ;;  %v90_v1 = vadd.f32 %v89_v57, %v88_v49  ;;  %v97_v2 = vadd.f32 %v96_v58, %v95_v50  ;;  %s259_s8 = scalar_lea.vmem %s215_s6, 16  ;;  %s263_s9 = scalar_lea.vmem %s215_s6, 32 }
  0x26   :  { %v103_v3 = vrot.slane %v102_v59, 1  ;;  %v109_v4 = vmul.f32 0.125, %v76_v56  ;;  %v121_v6 = vmul.f32 %v223_v60, %v106_v62  ;;  %v122_v7 = vmul.f32 %v223_v60, %v107_v63  ;;  %p260_p8 = scmp.ne.s32.totalorder %s215_s6, %s259_s8  ;;  %p264_p9 = scmp.lt.s32.totalorder %s215_s6, %s215_s6 }
  0x27   :  { %v110_v5 = vmul.f32 0.125, %v83_v61  ;;  %v123_v8 = vmul.f32 %v223_v60, %v108_v0  ;;  %v111_v10 = vmul.f32 0.125, %v90_v1  ;;  %v112_v11 = vmul.f32 0.125, %v97_v2  ;;  %p265_p10 = scmp.lt.s32.totalorder %s263_s9, %s259_s8 }
  0x28   :  { %v104_v9 = vadd.f32 %v103_v3, %v102_v59  ;;  %v124_v12 = vmul.f32 %v223_v60, %v109_v4  ;;  %v137_v14 = vrot.slane %v122_v7, 7  ;;  %vm144_vm3 = vcmask 1043459  }
  0x29   :  { %v125_v13 = vmul.f32 %v223_v60, %v110_v5  ;;  %v140_v15 = vrot.slane %v123_v8, 6  ;;  %v126_v17 = vmul.f32 %v223_v60, %v111_v10  ;;  %v127_v18 = vmul.f32 %v223_v60, %v112_v11  ;;  %p266_p11 = por %p265_p10, %p264_p9 }
  0x2a   :  { %v113_v16 = vmul.f32 0.125, %v104_v9  ;;  %v143_v19 = vrot.slane %v124_v12, 5  ;;  %v139_v20 = vsel %vm138_vm1, %v137_v14, %v121_v6  ;;  %vm147_vm4 = vcmask 1044484  }
  0x2b   :  { %v146_v21 = vrot.slane %v125_v13, 4  ;;  %vm150_vm5 = vcmask 1045509   ;;  %v142_v23 = vsel %vm141_vm2, %v140_v15, %v139_v20  ;;  %v149_v24 = vrot.slane %v126_v17, 3  ;;  %p267_p12 = pnand %p266_p11, %p260_p8 }
  0x2c   :  { %v128_v22 = vmul.f32 %v223_v60, %v113_v16  ;;  %v152_v25 = vrot.slane %v127_v18, 2  ;;  %v145_v26 = vsel %vm144_vm3, %v143_v19, %v142_v23  ;;  %vm153_vm6 = vcmask 1046534  }
  0x2d   :  { %v148_v27 = vsel %vm147_vm4, %v146_v21, %v145_v26  ;;  %vm156_vm7 = vcmask 1047559   ;;  %vm38_vm8 = vcmask 0   ;;  %v288_v33 = vmov 0.0  }
  0x2e   :  { %v155_v28 = vrot.slane %v128_v22, 1  ;;  %v151_v29 = vsel %vm150_vm5, %v149_v24, %v148_v27  ;;  %39 = vst.msk [vmem:[#allocation6] sm:$0x1] %vm38_vm8, %v288_v33  ;;  %vm171_vm9 = vcmp.ne.f32.partialorder %v170_v46, -1.0  ;;  %vm193_vm11 = vcmask 7168  }
  0x2f   :  { %v154_v30 = vsel %vm153_vm6, %v152_v25, %v151_v29  ;;  %v225_v53 = vsel %vm171_vm9, 1.0, %v288_v33 }
  0x30   :  { %v157_v31 = vsel %vm156_vm7, %v155_v28, %v154_v30 }
  0x31   :  { %v159_v32 = vsel %vm48_vm0, %v157_v31, 0.0 }
  0x32   :  { %160 = vadd.xlane.f32.xlu0 %v159_v32 }
  0x35   :  { %v191_v0 = vld [vmem:[#allocation6] sm:$0x1] }
  0xbf   :  { %v161_v35 = vpop.xlane.xlu0 %160 }
  0xc0   :  { %v169_v36 = vadd.f32 %v224_v34, %v161_v35 }
  0xc2   :  { %v175_v37 = vand.u32 2147483647, %v169_v36  ;;  %v174_v49 = vmax.f32 %v169_v36, 0.0  ;;  %v189_v51 = vmul.f32 %v170_v46, %v169_v36 }
  0xc4   :  { %v176_v38 = vsub.f32 0.0, %v175_v37 }
  0xc6   :  { %v177_v39 = vmul.f32 1.442695, %v176_v38 }
  0xc8   :  { %233 = vpow2.f32 %v177_v39 }
  0xd2   :  { %v234_v40 = vpop.eup %233 }
  0xd3   :  { %v179_v41 = vadd.f32 1.0, %v234_v40  ;;  %v182_v42 = vmul.f32 -0.5, %v234_v40  ;;  %v185_v44 = vand.u32 2147483647, %v234_v40 }
  0xd5   :  { %235 = vlog2.f32 %v179_v41  ;;  %v183_v43 = vadd.f32 1.0, %v182_v42  ;;  %vm186_vm10 = vcmp.lt.f32.partialorder %v185_v44, 0.0004427343 }
  0xd7   :  { %v184_v48 = vmul.f32 %v234_v40, %v183_v43 }
  0xdf   :  { %v236_v45 = vpop.eup %235 }
  0xe0   :  { %v181_v47 = vmul.f32 0.6931472, %v236_v45 }
  0xe2   :  { %v187_v50 = vsel %vm186_vm10, %v184_v48, %v181_v47 }
  0xe3   :  { %v188_v52 = vadd.f32 %v187_v50, %v174_v49 }
  0xe5   :  { %v190_v54 = vsub.f32 %v188_v52, %v189_v51 }
  0xe7   :  { %v192_v55 = vmul.f32 %v225_v53, %v190_v54 }
  0xe9   :  { %v194_v56 = vsel %vm193_vm11, %v192_v55, 0.0 }
  0xea   :  { %195 = vadd.xlane.f32.xlu0 %v194_v56 }
 0x177   :  { %v196_v57 = vpop.xlane.xlu0 %195 }
 0x178   :  { %v197_v58 = vrot.slane %v196_v57, 4 }
 0x17a   :  { %v198_v59 = vadd.f32 %v197_v58, %v196_v57 }
 0x17c   :  { %v199_v60 = vrot.slane %v198_v59, 2 }
 0x17e   :  { %v200_v61 = vadd.f32 %v199_v60, %v198_v59 }
 0x180   :  { %v201_v62 = vrot.slane %v200_v61, 1 }
 0x182   :  { %v202_v63 = vadd.f32 %v201_v62, %v200_v61 }
 0x184   :  { %226 = vpush %v202_v63 }
 0x1b5   :  { %s227_s7 = spop %226 }
 0x1b6   :  { %v204_v1 = vstv %s227_s7 }
 0x1b7   :  { %v205_v2 = vadd.f32 %v204_v1, %v191_v0 }
 0x1b9   :  { %207 = vst.msk [vmem:[#allocation6] sm:$0x1] %vm38_vm8, %v205_v2 }
 0x1ba   :  { %270 = shalt.err (!%p267_p12)
}
 0x1bb   :  { %s271_s12 = scalar_lea.hbm %s365_s4, 16 }
 0x1bc   :  { %p272_p13 = scmp.ne.s32.totalorder %s365_s4, %s271_s12  ;;  %p275_p0 = scmp.lt.u32.totalorder %s271_s12, %s365_s4 }
 0x1be   :  { %p277_p1 = pnand %p275_p0, %p272_p13 }
 0x1c0   :  { %280 = shalt.err (!%p277_p1)
}
 0x1c1   :  { %217 = dma.vmem_to_hbm [thread:$0]  %s215_s6, 16, %s365_s4, [#allocation5]  }
 0x1c2   :  { %283 = dma.done.wait [#allocation5], 16  }
 0x1c3   :  { %284 = vsyncadd [#allocation5], 4294967280 }
 0x1c4   :  { %221 = vsyncpa [#allocation4], 1 }
 0x1c5   :  { %222 = vsyncpa [#allocation5], 1 }

</bundles_post_ra>
